<compile_context>
chip_gen: v7x
topology: tpu7x:2x2x1
jax: 0.10.0
libtpu: 0.0.40
codegen_flags: <defaults>
</compile_context>

<pallas_src>
import functools

import jax
import jax.numpy as jnp
import numpy as np
from jax.experimental import pallas as pl
from jax.experimental.pallas import tpu as pltpu


# ----------------------------------------------------------------------------
# helpers
# ----------------------------------------------------------------------------
def _round_up(a: int, b: int) -> int:
    return ((a + b - 1) // b) * b


@functools.lru_cache(maxsize=None)
def _dft_matrix(n: int, m: int) -> np.ndarray:
    """Packed truncated real-DFT matrix (N, 2M) = [cos | -sin], fp64->fp32.

    Matches torch.fft.rfft (norm='backward', no scaling), first m modes only.
    """
    t = np.arange(n, dtype=np.float64)[:, None]
    k = np.arange(m, dtype=np.float64)[None, :]
    ang = 2.0 * np.pi * t * k / float(n)
    return np.concatenate([np.cos(ang), -np.sin(ang)], axis=1).astype(np.float32)


def _pick_col_tile(z_pad: int, max_tile: int) -> int:
    """Largest multiple-of-128 divisor of z_pad that is <= max_tile."""
    assert z_pad % 128 == 0
    max_tile = max(128, int(max_tile))
    if z_pad <= max_tile:
        return z_pad
    best = 128
    t = 128
    while t <= max_tile:
        if z_pad % t == 0:
            best = t
        t += 128
    return best


# ----------------------------------------------------------------------------
# kernel
# ----------------------------------------------------------------------------
def _spectral_kernel(x_ref, dft_ref, q_ref, o_ref):
    # x_ref:   (C_in, b_tile, N)      channel-major batch tile
    # dft_ref: (N, 2M)                packed [cos | -sin], grid-resident
    # q_ref:   (C_in, 2M, z_tile)     folded (complex mixing @ basis.T)
    # o_ref:   (b_tile, z_tile)       lane-dense output slab (z_tile % 128 == 0)
    c_in = x_ref.shape[0]
    b_tile = x_ref.shape[1]
    z_tile = o_ref.shape[1]

    dft = dft_ref[...]                                          # (N, 2M)
    acc = jnp.zeros((b_tile, z_tile), jnp.float32)

    # Static unroll over input channels: every op below is an MXU matmul with
    # f32 accumulation.  (C_in is small and static.)
    for i in range(c_in):
        xf = jnp.dot(x_ref[i], dft,
                     preferred_element_type=jnp.float32)        # (b_tile, 2M)
        xf = xf.astype(dft.dtype)
        acc = acc + jnp.dot(xf, q_ref[i],
                            preferred_element_type=jnp.float32)  # (b_tile, z_tile)

    o_ref[...] = acc.astype(o_ref.dtype)


# ----------------------------------------------------------------------------
# wrapper
# ----------------------------------------------------------------------------
def spectral_m1d(x, w_real, w_imag, basis, *, b_tile=None, max_z_tile=2048,
                 compute_dtype=jnp.float32, vmem_budget_bytes=24 * 2**20):
    """Pallas implementation of SpectralM1d.forward.

    x:       (B, C_in, N)     float32
    w_real:  (C_in, C_out, M) float32  (real part of weights1)
    w_imag:  (C_in, C_out, M) float32  (imag part of weights1)
    basis:   (N_out, 2*M)     float32
    returns: (B, C_out, N_out) float32
    """
    B, c_in, N = x.shape
    c_in2, c_out, m = w_real.shape
    n_out, two_m = basis.shape
    assert c_in2 == c_in and two_m == 2 * m

    cdt = jnp.dtype(compute_dtype)
    isz = cdt.itemsize

    # ---- constants / folded parameters (wrapper-side, plain XLA) -----------
    dft = jnp.asarray(_dft_matrix(N, m)).astype(cdt)            # (N, 2M)

    # Fold the complex channel mixing with the basis projection into per-input-
    # channel matrices Q[i] of shape (2M, C_out*N_out):
    #   y[b,o,n] = sum_i sum_q xft_packed[b,i,q] * Q[i, q, o*N_out + n]
    br = basis[:, :m]                                           # (N_out, M)
    bi = basis[:, m:]                                           # (N_out, M)
    q_r = (jnp.einsum('iok,nk->ikon', w_real, br)
           + jnp.einsum('iok,nk->ikon', w_imag, bi))            # coeff of Re(x_ft)
    q_i = (jnp.einsum('iok,nk->ikon', w_real, bi)
           - jnp.einsum('iok,nk->ikon', w_imag, br))            # coeff of Im(x_ft)
    z = c_out * n_out
    q = jnp.concatenate([q_r, q_i], axis=1).reshape(c_in, 2 * m, z).astype(cdt)

    # Lane-dense output: pad the flattened output width to a multiple of 128
    # (zero columns in Q) so output stores are unmasked full-lane vst.
    z_pad = _round_up(z, 128)
    if z_pad != z:
        q = jnp.pad(q, ((0, 0), (0, 0), (0, z_pad - z)))
    z_tile = _pick_col_tile(z_pad, max_z_tile)

    # ---- batch tiling (channel-major layout, batch padded to a tile) -------
    if b_tile is None:
        b_tile = min(512, _round_up(B, 8))
    b_tile = max(8, _round_up(min(int(b_tile), _round_up(B, 8)), 8))

    def vmem_est(bt, zt):
        return (2 * c_in * bt * N * isz          # x blocks (double-buffered)
                + 2 * c_in * 2 * m * zt * isz    # q blocks (double-buffered)
                + 2 * bt * zt * 4                # out blocks (double-buffered)
                + N * 2 * m * isz                # resident DFT
                + bt * zt * 4)                   # accumulator headroom

    # Auto-shrink tiles to the VMEM budget (biggest tiles that fit).
    while b_tile > 8 and vmem_est(b_tile, z_tile) > vmem_budget_bytes:
        b_tile = max(8, _round_up(b_tile // 2, 8))
    while z_tile > 128 and vmem_est(b_tile, z_tile) > vmem_budget_bytes:
        z_tile = _pick_col_tile(z_pad, z_tile - 128)

    b_pad = _round_up(B, b_tile)
    x_cm = jnp.transpose(x, (1, 0, 2)).astype(cdt)              # (C_in, B, N)
    if b_pad != B:
        x_cm = jnp.pad(x_cm, ((0, 0), (0, b_pad - B), (0, 0)))

    nb = b_pad // b_tile
    nz = z_pad // z_tile

    est = vmem_est(b_tile, z_tile)
    vmem_limit = int(min(56 * 2**20, max(32 * 2**20, 2 * est)))

    out2 = pl.pallas_call(
        _spectral_kernel,
        out_shape=jax.ShapeDtypeStruct((b_pad, z_pad), jnp.float32),
        grid=(nb, nz),
        in_specs=[
            pl.BlockSpec((c_in, b_tile, N), lambda b, zz: (0, b, 0)),
            pl.BlockSpec((N, 2 * m), lambda b, zz: (0, 0)),
            pl.BlockSpec((c_in, 2 * m, z_tile), lambda b, zz: (0, 0, zz)),
        ],
        out_specs=pl.BlockSpec((b_tile, z_tile), lambda b, zz: (b, zz)),
        compiler_params=pltpu.CompilerParams(
            dimension_semantics=("parallel", "parallel"),
            vmem_limit_bytes=vmem_limit),
    )(x_cm, dft, q)

    y = out2[:B, :z].reshape(B, c_out, n_out).astype(x.dtype)
    return y


# ----------------------------------------------------------------------------
# pure-JAX reference (mirrors the PyTorch forward)
# ----------------------------------------------------------------------------
def spectral_m1d_ref(x, w_real, w_imag, basis):
    m = w_real.shape[-1]
    x_ft = jnp.fft.rfft(x)[:, :, :m]                            # (B, C_in, M) complex
    w = w_real + 1j * w_imag                                    # (C_in, C_out, M)
    out_ft = jnp.einsum('bix,iox->box', x_ft, w)                # (B, C_out, M) complex
    out = jnp.concatenate(
        [jnp.real(out_ft), jnp.imag(out_ft)], axis=2)           # (B, C_out, 2M)
    return (out @ basis.T).astype(jnp.float32)


if __name__ == "__main__":
    key = jax.random.PRNGKey(0)
    k_x, k_wr, k_wi, k_b = jax.random.split(key, 4)

    # Module hyperparameters (small, consistent with the forward pass).
    B = 2
    in_channels = 4
    out_channels = 4
    modes1 = 8                       # module keeps modes1 // 2 = 4 modes
    M = modes1 // 2
    N = 16                           # spatial length of x
    N_out = 16                       # basis output length

    scale = 1.0 / (in_channels * out_channels)
    x = jax.random.normal(k_x, (B, in_channels, N), dtype=jnp.float32)
    # weights1 = scale * rand(cfloat): uniform [0,1) real and imag parts.
    w_real = scale * jax.random.uniform(k_wr, (in_channels, out_channels, M),
                                        dtype=jnp.float32)
    w_imag = scale * jax.random.uniform(k_wi, (in_channels, out_channels, M),
                                        dtype=jnp.float32)
    basis = jax.random.normal(k_b, (N_out, 2 * M), dtype=jnp.float32)

    y_ref = jax.block_until_ready(spectral_m1d_ref(x, w_real, w_imag, basis))

    # f32 path (default): exact module semantics, tight tolerance.
    y = jax.block_until_ready(spectral_m1d(x, w_real, w_imag, basis))
    np.testing.assert_allclose(np.asarray(y), np.asarray(y_ref),
                               rtol=1e-4, atol=1e-4)

    # bf16 matmul inputs with f32 accumulation (perf option), loose tolerance.
    y_bf16 = jax.block_until_ready(
        spectral_m1d(x, w_real, w_imag, basis, compute_dtype=jnp.bfloat16))
    np.testing.assert_allclose(np.asarray(y_bf16), np.asarray(y_ref),
                               rtol=5e-2, atol=5e-2)

    print("KERNEL_OK")
</pallas_src>

<mosaic_0001>
module attributes {stable_mosaic.version = 11 : i64} {
  func.func @_spectral_kernel(%arg0: i32, %arg1: i32, %arg2: memref<4x8x16xf32, #tpu.memory_space<vmem>>, %arg3: memref<16x8xf32, #tpu.memory_space<vmem>>, %arg4: memref<4x8x128xf32, #tpu.memory_space<vmem>>, %arg5: memref<8x128xf32, #tpu.memory_space<vmem>>) attributes {dimension_semantics = [#tpu.dimension_semantics<parallel>, #tpu.dimension_semantics<parallel>], iteration_bounds = array<i64: 1, 1>, scalar_prefetch = 0 : i64, scratch_operands = 0 : i64, tpu.core_type = #tpu.core_type<tc>, window_params = [{transform_indices = @transform_0, window_bounds = array<i64: 4, 8, 16>}, {pipeline_mode = #tpu.pipeline_mode<synchronous>, transform_indices = @transform_1, window_bounds = array<i64: 16, 8>}, {transform_indices = @transform_2, window_bounds = array<i64: 4, 8, 128>}, {transform_indices = @transform_3, window_bounds = array<i64: 8, 128>}]} {
    %c0 = arith.constant 0 : index
    %c0_0 = arith.constant 0 : index
    %0 = vector.load %arg3[%c0, %c0_0] : memref<16x8xf32, #tpu.memory_space<vmem>>, vector<16x8xf32>
    %cst = arith.constant 0.000000e+00 : f32
    %1 = vector.broadcast %cst : f32 to vector<8x128xf32>
    %c0_1 = arith.constant 0 : index
    %c0_2 = arith.constant 0 : index
    %c0_3 = arith.constant 0 : index
    %2 = vector.load %arg2[%c0_1, %c0_2, %c0_3] : memref<4x8x16xf32, #tpu.memory_space<vmem>>, vector<1x8x16xf32>
    %3 = vector.shape_cast %2 : vector<1x8x16xf32> to vector<8x16xf32>
    %cst_4 = arith.constant dense<0.000000e+00> : vector<8x8xf32>
    %4 = tpu.matmul %3, %0, %cst_4 {dimension_numbers = #tpu.dot_dimension_numbers<[1], [0], [0], [1], [0, 0, 1, 1], [], []>} : vector<8x16xf32>, vector<16x8xf32>, vector<8x8xf32> -> vector<8x8xf32>
    %c0_5 = arith.constant 0 : index
    %c0_6 = arith.constant 0 : index
    %c0_7 = arith.constant 0 : index
    %5 = vector.load %arg4[%c0_5, %c0_6, %c0_7] : memref<4x8x128xf32, #tpu.memory_space<vmem>>, vector<1x8x128xf32>
    %6 = vector.shape_cast %5 : vector<1x8x128xf32> to vector<8x128xf32>
    %cst_8 = arith.constant dense<0.000000e+00> : vector<8x128xf32>
    %7 = tpu.matmul %4, %6, %cst_8 {dimension_numbers = #tpu.dot_dimension_numbers<[1], [0], [0], [1], [0, 0, 1, 1], [], []>} : vector<8x8xf32>, vector<8x128xf32>, vector<8x128xf32> -> vector<8x128xf32>
    %8 = arith.addf %1, %7 : vector<8x128xf32>
    %c1 = arith.constant 1 : index
    %c0_9 = arith.constant 0 : index
    %c0_10 = arith.constant 0 : index
    %9 = vector.load %arg2[%c1, %c0_9, %c0_10] : memref<4x8x16xf32, #tpu.memory_space<vmem>>, vector<1x8x16xf32>
    %10 = vector.shape_cast %9 : vector<1x8x16xf32> to vector<8x16xf32>
    %cst_11 = arith.constant dense<0.000000e+00> : vector<8x8xf32>
    %11 = tpu.matmul %10, %0, %cst_11 {dimension_numbers = #tpu.dot_dimension_numbers<[1], [0], [0], [1], [0, 0, 1, 1], [], []>} : vector<8x16xf32>, vector<16x8xf32>, vector<8x8xf32> -> vector<8x8xf32>
    %c1_12 = arith.constant 1 : index
    %c0_13 = arith.constant 0 : index
    %c0_14 = arith.constant 0 : index
    %12 = vector.load %arg4[%c1_12, %c0_13, %c0_14] : memref<4x8x128xf32, #tpu.memory_space<vmem>>, vector<1x8x128xf32>
    %13 = vector.shape_cast %12 : vector<1x8x128xf32> to vector<8x128xf32>
    %cst_15 = arith.constant dense<0.000000e+00> : vector<8x128xf32>
    %14 = tpu.matmul %11, %13, %cst_15 {dimension_numbers = #tpu.dot_dimension_numbers<[1], [0], [0], [1], [0, 0, 1, 1], [], []>} : vector<8x8xf32>, vector<8x128xf32>, vector<8x128xf32> -> vector<8x128xf32>
    %15 = arith.addf %8, %14 : vector<8x128xf32>
    %c2 = arith.constant 2 : index
    %c0_16 = arith.constant 0 : index
    %c0_17 = arith.constant 0 : index
    %16 = vector.load %arg2[%c2, %c0_16, %c0_17] : memref<4x8x16xf32, #tpu.memory_space<vmem>>, vector<1x8x16xf32>
    %17 = vector.shape_cast %16 : vector<1x8x16xf32> to vector<8x16xf32>
    %cst_18 = arith.constant dense<0.000000e+00> : vector<8x8xf32>
    %18 = tpu.matmul %17, %0, %cst_18 {dimension_numbers = #tpu.dot_dimension_numbers<[1], [0], [0], [1], [0, 0, 1, 1], [], []>} : vector<8x16xf32>, vector<16x8xf32>, vector<8x8xf32> -> vector<8x8xf32>
    %c2_19 = arith.constant 2 : index
    %c0_20 = arith.constant 0 : index
    %c0_21 = arith.constant 0 : index
    %19 = vector.load %arg4[%c2_19, %c0_20, %c0_21] : memref<4x8x128xf32, #tpu.memory_space<vmem>>, vector<1x8x128xf32>
    %20 = vector.shape_cast %19 : vector<1x8x128xf32> to vector<8x128xf32>
    %cst_22 = arith.constant dense<0.000000e+00> : vector<8x128xf32>
    %21 = tpu.matmul %18, %20, %cst_22 {dimension_numbers = #tpu.dot_dimension_numbers<[1], [0], [0], [1], [0, 0, 1, 1], [], []>} : vector<8x8xf32>, vector<8x128xf32>, vector<8x128xf32> -> vector<8x128xf32>
    %22 = arith.addf %15, %21 : vector<8x128xf32>
    %c3 = arith.constant 3 : index
    %c0_23 = arith.constant 0 : index
    %c0_24 = arith.constant 0 : index
    %23 = vector.load %arg2[%c3, %c0_23, %c0_24] : memref<4x8x16xf32, #tpu.memory_space<vmem>>, vector<1x8x16xf32>
    %24 = vector.shape_cast %23 : vector<1x8x16xf32> to vector<8x16xf32>
    %cst_25 = arith.constant dense<0.000000e+00> : vector<8x8xf32>
    %25 = tpu.matmul %24, %0, %cst_25 {dimension_numbers = #tpu.dot_dimension_numbers<[1], [0], [0], [1], [0, 0, 1, 1], [], []>} : vector<8x16xf32>, vector<16x8xf32>, vector<8x8xf32> -> vector<8x8xf32>
    %c3_26 = arith.constant 3 : index
    %c0_27 = arith.constant 0 : index
    %c0_28 = arith.constant 0 : index
    %26 = vector.load %arg4[%c3_26, %c0_27, %c0_28] : memref<4x8x128xf32, #tpu.memory_space<vmem>>, vector<1x8x128xf32>
    %27 = vector.shape_cast %26 : vector<1x8x128xf32> to vector<8x128xf32>
    %cst_29 = arith.constant dense<0.000000e+00> : vector<8x128xf32>
    %28 = tpu.matmul %25, %27, %cst_29 {dimension_numbers = #tpu.dot_dimension_numbers<[1], [0], [0], [1], [0, 0, 1, 1], [], []>} : vector<8x8xf32>, vector<8x128xf32>, vector<8x128xf32> -> vector<8x128xf32>
    %29 = arith.addf %22, %28 : vector<8x128xf32>
    %c0_30 = arith.constant 0 : index
    %c0_31 = arith.constant 0 : index
    %30 = vector.load %arg5[%c0_30, %c0_31] : memref<8x128xf32, #tpu.memory_space<vmem>>, vector<8x128xf32>
    tpu.vector_store %arg5[%c0_30, %c0_31], %29 {strides = array<i32>} : memref<8x128xf32, #tpu.memory_space<vmem>>, vector<8x128xf32>,
    return
  }
  func.func @transform_0(%arg0: i32, %arg1: i32) -> (i32, i32, i32) {
    %c0_i32 = arith.constant 0 : i32
    %c0_i32_0 = arith.constant 0 : i32
    %c0_i32_1 = arith.constant 0 : i32
    return %c0_i32, %arg0, %c0_i32_0 : i32, i32, i32
  }
  func.func @transform_1(%arg0: i32, %arg1: i32) -> (i32, i32) {
    %c0_i32 = arith.constant 0 : i32
    %c0_i32_0 = arith.constant 0 : i32
    %c0_i32_1 = arith.constant 0 : i32
    return %c0_i32, %c0_i32_0 : i32, i32
  }
  func.func @transform_2(%arg0: i32, %arg1: i32) -> (i32, i32, i32) {
    %c0_i32 = arith.constant 0 : i32
    %c0_i32_0 = arith.constant 0 : i32
    %c0_i32_1 = arith.constant 0 : i32
    return %c0_i32, %c0_i32_0, %arg1 : i32, i32, i32
  }
  func.func @transform_3(%arg0: i32, %arg1: i32) -> (i32, i32) {
    %c0_i32 = arith.constant 0 : i32
    return %arg0, %arg1 : i32, i32
  }
}

</mosaic_0001>

<bundles_post_ra>
// kernel: tpu_custom_call.1
= control target key start
LH: loop header
LB: loop body
LE: loop exit
PB: predicated region body
PF: predicated region fallthrough
CT: control target
= control target key end

     0   :  { %8 = vsyncpa [#allocation3], 0  ;;  %s924_s0 = inlined_call_operand.hbm [shape: f32[4,8,16], index: 0, kind: input, shape index: {}]   ;;  %s925_s1 = inlined_call_operand.vmem [shape: f32[16,8], index: 1, kind: input, shape index: {}]   ;;  %s926_s2 = inlined_call_operand.hbm [shape: f32[4,8,128], index: 2, kind: input, shape index: {}]   ;;  %s927_s3 = inlined_call_operand.hbm [shape: f32[8,128], index: 3, kind: output, shape index: {}]  }
   0x1   :  { %9 = vsyncpa [#allocation6], 0 }
   0x2   :  { %10 = vsyncpa [#allocation4], 0  ;;  %s838_s12 = smov [#allocation2]   ;;  %s766_s16 = scalar_lea.hbm %s924_s0, 512 }
   0x3   :  { %s16_s13 = sshll.u32 %s838_s12, 4  ;;  %p767_p0 = scmp.ne.s32.totalorder %s924_s0, %s766_s16  ;;  %s17_s13 = int_to_ptr.vmem [resolvable:$true] %s16_s13 }
   0x4   :  { %p770_p1 = scmp.lt.u32.totalorder %s766_s16, %s924_s0 }
   0x6   :  { %p772_p2 = pnand %p770_p1, %p767_p0 }
   0x8   :  { %775 = shalt.err (!%p772_p2)
}
   0x9   :  { %s776_s21 = scalar_lea.vmem %s17_s13, 512  ;;  %p781_p4 = scmp.lt.s32.totalorder %s17_s13, %s17_s13 }
   0xa   :  { %p777_p3 = scmp.ne.s32.totalorder %s17_s13, %s776_s21  ;;  %p782_p5 = scmp.lt.s32.totalorder %s776_s21, %s776_s21 }
   0xc   :  { %p783_p6 = por %p782_p5, %p781_p4 }
   0xe   :  { %p784_p7 = pnand %p783_p6, %p777_p3 }
  0x10   :  { %787 = shalt.err (!%p784_p7)
}
  0x11   :  { %s839_s22 = smov 128   ;;  %s840_s23 = smov 8  }
  0x12   :  { %22 = dma.hbm_to_vmem [thread:$0]  %s924_s0, 512, %s17_s13, [#allocation3], %s839_s22, %s839_s22, %s840_s23  }
  0x13   :  { %s841_s26 = smov [#allocation5]   ;;  %s788_s30 = scalar_lea.hbm %s926_s2, 512 }
  0x14   :  { %s30_s27 = sshll.u32 %s841_s26, 4  ;;  %p789_p8 = scmp.ne.s32.totalorder %s926_s2, %s788_s30  ;;  %s31_s27 = int_to_ptr.vmem [resolvable:$true] %s30_s27 }
  0x15   :  { %p792_p9 = scmp.lt.u32.totalorder %s788_s30, %s926_s2 }
  0x17   :  { %p794_p10 = pnand %p792_p9, %p789_p8 }
  0x19   :  { %797 = shalt.err (!%p794_p10)
}
  0x1a   :  { %s798_s8 = scalar_lea.vmem %s31_s27, 512  ;;  %p803_p12 = scmp.lt.s32.totalorder %s31_s27, %s31_s27 }
  0x1b   :  { %p799_p11 = scmp.ne.s32.totalorder %s31_s27, %s798_s8  ;;  %p804_p13 = scmp.lt.s32.totalorder %s798_s8, %s798_s8 }
  0x1d   :  { %p805_p0 = por %p804_p13, %p803_p12 }
  0x1f   :  { %p806_p1 = pnand %p805_p0, %p799_p11 }
  0x21   :  { %809 = shalt.err (!%p806_p1)
}
  0x22   :  { %36 = dma.hbm_to_vmem [thread:$0]  %s926_s2, 512, %s31_s27, [#allocation6], %s839_s22, %s839_s22, %s840_s23  }
  0x23   :  { %832 = dma.done.wait [#allocation3], 512  }
  0x24   :  { %833 = vsyncadd [#allocation3], 4294966784 }
  0x25   :  { %834 = dma.done.wait [#allocation6], 512  }
  0x26   :  { %835 = vsyncadd [#allocation6], 4294966784  ;;  %v842_v0 = vmov 0.0|0.0   ;;  %vm843_vm0 = vmmov 0   ;;  %v844_v1 = vmov 0.0   ;;  %v43_v2 = vld [vmem:[%s925_s1] sm:$0xff] }
  0x27   :  { %740 = vmatprep.subr.bf16.mxu1 %v842_v0  ;;  %696 = vmatprep.mubr.msk.f32.mxu1 %vm843_vm0, %v844_v1  ;;  %v44_v3 = vld [vmem:[%s925_s1 + $0x8] sm:$0xff]  ;;  %v45_v5 = vld [vmem:[#allocation2] sm:$0xff]  ;;  %vm46_vm1 = vcmask 130048   ;;  %v346_v7 = vld [vmem:[#allocation2 + $0x10] sm:$0xff]  ;;  %vm198_vm2 = vcmask 64512   ;;  %s845_s1 = smov [#allocation7]  }
  0x28   :  { %706 = vmatprep.subr.mxu0 %v844_v1  ;;  %708 = vmatprep.mubr.msk.f32.mxu0 %vm843_vm0, %v844_v1  ;;  %v741_v4 = vpack.c.bf16 %v44_v3, %v43_v2  ;;  %v122_v6 = vld [vmem:[#allocation2 + $0x8] sm:$0xff]  ;;  %v497_v8 = vld [vmem:[#allocation2 + $0x18] sm:$0xff]  ;;  %v120_v12 = vld [vmem:[#allocation5] sm:$0xff]  ;;  %s654_s2 = sshll.u32 %s845_s1, 4  ;;  %s655_s2 = int_to_ptr.vmem [resolvable:$true] %s654_s2 }
  0x29   :  { %v197_v9 = vld [vmem:[#allocation5 + $0x8] sm:$0xff]  ;;  %v421_v17 = vld [vmem:[#allocation5 + $0x10] sm:$0xff]  ;;  %v572_v20 = vld [vmem:[#allocation5 + $0x18] sm:$0xff]  ;;  %s810_s14 = scalar_lea.vmem %s655_s2, 128  ;;  %p815_p3 = scmp.lt.s32.totalorder %s655_s2, %s655_s2 }
  0x2a   :  { %742 = vmatpush3.bf16.msra.mxu1 %v741_v4  ;;  %707 = vmatpush3.msra.mxu0 %v197_v9  ;;  %p811_p2 = scmp.ne.s32.totalorder %s655_s2, %s810_s14  ;;  %p816_p4 = scmp.lt.s32.totalorder %s810_s14, %s810_s14 }
  0x2b   :  { %743 = vmatprep.subr.bf16.mxu1 %v842_v0  ;;  %711 = vmatprep.subr.mxu0 %v844_v1 }
  0x2c   :  { %p817_p5 = por %p816_p4, %p815_p3 }
  0x2d   :  { %697 = vmatmul.mubr.msk.f32.vlgmr.msra.gmra.mrb[0].mxu1 %vm46_vm1, %v45_v5 }
  0x2e   :  { %745 = vmatpush3.bf16.msra.mxu1 %v741_v4  ;;  %703 = vmatprep.mubr.msk.f32.mxu1 %vm843_vm0, %v844_v1  ;;  %p818_p6 = pnand %p817_p5, %p811_p2 }
  0x2f   :  { %746 = vmatprep.subr.bf16.mxu1 %v842_v0 }
  0x31   :  { %704 = vmatmul.mubr.msk.f32.vlgmr.msra.gmra.mrb[2].mxu1 %vm46_vm1, %v122_v6 }
  0x32   :  { %748 = vmatpush3.bf16.msra.mxu1 %v741_v4  ;;  %720 = vmatprep.mubr.msk.f32.mxu1 %vm843_vm0, %v844_v1 }
  0x33   :  { %749 = vmatprep.subr.bf16.mxu1 %v842_v0 }
  0x35   :  { %721 = vmatmul.mubr.msk.f32.vlgmr.msra.gmra.mrb[4].mxu1 %vm46_vm1, %v346_v7 }
  0x36   :  { %751 = vmatpush3.bf16.msra.mxu1 %v741_v4  ;;  %732 = vmatprep.mubr.msk.f32.mxu1 %vm843_vm0, %v844_v1 }
  0x39   :  { %733 = vmatmul.mubr.msk.f32.vlgmr.msra.gmra.mrb[6].mxu1 %vm46_vm1, %v497_v8 }
 0x100   :  { %v116_v10 = vpop.f32.mrb[0].mxu1 }
 0x101   :  { %v698_v11 = vpop.f32.mrb[1].mxu1 }
 0x104   :  { %v192_v13 = vpop.f32.mrb[2].mxu1 }
 0x105   :  { %v705_v14 = vpop.f32.mrb[3].mxu1  ;;  %709 = vmatmul.mubr.msk.f32.vlgmr.msra.gmra.mrb[0].mxu0 %vm198_vm2, %v192_v13 }
 0x106   :  { %712 = vmatpush3.msra.mxu0 %v120_v12  ;;  %713 = vmatprep.mubr.msk.f32.mxu0 %vm843_vm0, %v844_v1 }
 0x107   :  { %723 = vmatprep.subr.mxu0 %v844_v1 }
 0x108   :  { %v416_v15 = vpop.f32.mrb[4].mxu1 }
 0x109   :  { %v722_v16 = vpop.f32.mrb[5].mxu1 }
 0x10c   :  { %v567_v18 = vpop.f32.mrb[6].mxu1 }
 0x10d   :  { %714 = vmatmul.mubr.msk.f32.vlgmr.msra.gmra.mrb[0].mxu0 %vm198_vm2, %v116_v10  ;;  %v734_v19 = vpop.f32.mrb[7].mxu1 }
 0x10e   :  { %724 = vmatpush3.msra.mxu0 %v421_v17  ;;  %725 = vmatprep.mubr.msk.f32.mxu0 %vm843_vm0, %v844_v1 }
 0x10f   :  { %735 = vmatprep.subr.mxu0 %v844_v1 }
 0x115   :  { %726 = vmatmul.mubr.msk.f32.vlgmr.msra.gmra.mrb[0].mxu0 %vm198_vm2, %v416_v15 }
 0x116   :  { %736 = vmatpush3.msra.mxu0 %v572_v20  ;;  %737 = vmatprep.mubr.msk.f32.mxu0 %vm843_vm0, %v844_v1 }
 0x11d   :  { %738 = vmatmul.mubr.msk.f32.vlgmr.msra.gmra.mrb[0].mxu0 %vm198_vm2, %v567_v18 }
 0x1f0   :  { %v642_v21 = vpop.f32.mrb[0].mxu0 }
 0x1f1   :  { %647 = vst [vmem:[#allocation7] sm:$0xff] %v642_v21  ;;  %v739_v22 = vpop.f32.mrb[1].mxu0 }
 0x1f2   :  { %821 = shalt.err (!%p818_p6)
}
 0x1f3   :  { %s822_s17 = scalar_lea.hbm %s927_s3, 128 }
 0x1f4   :  { %p823_p7 = scmp.ne.s32.totalorder %s927_s3, %s822_s17  ;;  %p826_p8 = scmp.lt.u32.totalorder %s822_s17, %s927_s3 }
 0x1f6   :  { %p828_p9 = pnand %p826_p8, %p823_p7 }
 0x1f8   :  { %831 = shalt.err (!%p828_p9)
}
 0x1f9   :  { %657 = dma.vmem_to_hbm [thread:$0]  %s655_s2, 128, %s927_s3, [#allocation4]  }
 0x1fa   :  { %836 = dma.done.wait [#allocation4], 128  }
 0x1fb   :  { %837 = vsyncadd [#allocation4], 4294967168 }
 0x1fc   :  { %661 = vsyncpa [#allocation3], 1 }
 0x1fd   :  { %662 = vsyncpa [#allocation6], 1 }
 0x1fe   :  { %663 = vsyncpa [#allocation4], 1 }

</bundles_post_ra>
